<compile_context>
chip_gen: v5e
topology: v5e:2x2
jax: 0.10.0
libtpu: 0.0.40
codegen_flags: <defaults>
</compile_context>

<pallas_src>
import math

import jax
import jax.numpy as jnp
from jax.experimental import pallas as pl
from jax.experimental.pallas import tpu as pltpu


def _build_pe(d_model: int, max_seq_len: int, dtype=jnp.float32) -> jnp.ndarray:
    """Sinusoidal buffer, identical math to the PyTorch __init__."""
    assert d_model % 2 == 0, "sinusoidal PE (as written in the PyTorch module) needs even d_model"
    position = jnp.arange(0, max_seq_len, dtype=jnp.float32)[:, None]            # (S_max, 1)
    div_term = jnp.exp(
        jnp.arange(0, d_model, 2, dtype=jnp.float32) * -(math.log(10000.0) / d_model)
    )                                                                             # (D/2,)
    pe = jnp.zeros((max_seq_len, d_model), dtype=jnp.float32)
    pe = pe.at[:, 0::2].set(jnp.sin(position * div_term))
    pe = pe.at[:, 1::2].set(jnp.cos(position * div_term))
    return pe.astype(dtype)                                                       # (S_max, D)


def _add_pe_kernel(x_ref, pe_ref, o_ref):
    # Pure VPU elementwise add.  x/o tiles are (tS, D) or (B, tS, D); the pe tile is
    # (tS, D) and broadcasts over the leading batch dim when present.
    o_ref[...] = x_ref[...] + pe_ref[...]


def _round_up(n: int, m: int) -> int:
    return ((n + m - 1) // m) * m


_TARGET_TILE_BYTES = 2 << 20  # ~2 MiB per live buffer; HBM roofline saturates well below this


def _plan_tiles(B: int, S: int, D: int, dtype):
    """Returns (fold_batch, tS).  tS is dtype-sublane aligned; no need to divide S."""
    itemsize = jnp.dtype(dtype).itemsize
    pack = 8 * max(1, 4 // itemsize)          # 8 rows f32, 16 bf16/f16, 32 int8/fp8
    s_padded = _round_up(S, pack)
    # Prefer folding batch into the block (one grid step per S tile) when a folded
    # (B, tS, D) tile still gets at least one packed row group under the budget.
    rows_folded = (_TARGET_TILE_BYTES // max(1, B * D * itemsize)) // pack * pack
    if rows_folded >= pack:
        return True, min(rows_folded, s_padded)
    rows = max(pack, (_TARGET_TILE_BYTES // max(1, D * itemsize)) // pack * pack)
    return False, min(rows, s_padded)


def positional_encoding_forward(
    x: jnp.ndarray,
    pe: jnp.ndarray,
    *,
    core_parallel: bool | None = None,
    donate_x: bool = False,
) -> jnp.ndarray:
    """x: (B, S, D); pe: (max_seq_len, D). Returns x + pe[None, :S, :] in x.dtype."""
    B, S, D = x.shape
    max_seq_len = pe.shape[0]
    assert S <= max_seq_len, "sequence length exceeds positional-encoding buffer"
    assert pe.shape[1] == D, "pe feature dim must match x"
    if pe.dtype != x.dtype:
        # Callers should build pe in x.dtype once (see _build_pe) so this is a no-op
        # on the hot path; keeping the add in one dtype minimizes pe DMA bytes.
        pe = pe.astype(x.dtype)

    fold_batch, tS = _plan_tiles(B, S, D, x.dtype)
    num_s = pl.cdiv(S, tS)  # cdiv grid: edge block is padded by Pallas, OOB writes dropped

    # v7x has two TensorCores; CORE_PARALLEL reliably shards the S-tile axis across
    # them (worth up to ~2x for this HBM-bound add).  Only request it when there is
    # actually more than one S tile to split.
    if core_parallel is None:
        core_parallel = num_s >= 2
    outer_sem = pltpu.CORE_PARALLEL if core_parallel else "parallel"

    if fold_batch:
        grid = (num_s,)
        in_specs = [
            pl.BlockSpec((B, tS, D), lambda s: (0, s, 0)),   # x: whole batch per S tile
            pl.BlockSpec((tS, D), lambda s: (s, 0)),         # pe: full buffer, only rows < S touched
        ]
        out_spec = pl.BlockSpec((B, tS, D), lambda s: (0, s, 0))
        semantics = (outer_sem,)
    else:
        # S tile outer, batch inner -> pe block index is constant across the inner axis,
        # so its DMA is skipped for all but the first batch step of every S tile.
        grid = (num_s, B)
        in_specs = [
            pl.BlockSpec((pl.Squeezed(), tS, D), lambda s, b: (b, s, 0)),  # x
            pl.BlockSpec((tS, D), lambda s, b: (s, 0)),                    # pe
        ]
        out_spec = pl.BlockSpec((pl.Squeezed(), tS, D), lambda s, b: (b, s, 0))
        semantics = (outer_sem, "parallel")

    # TODO(synk): if D is not a multiple of 128, a wrapper-side reshape to a lane-dense
    # layout would avoid masked partial stores; correctness is unaffected either way.

    return pl.pallas_call(
        _add_pe_kernel,
        out_shape=jax.ShapeDtypeStruct((B, S, D), x.dtype),
        grid_spec=pltpu.PrefetchScalarGridSpec(
            num_scalar_prefetch=0,
            grid=grid,
            in_specs=in_specs,
            out_specs=out_spec,
        ),
        compiler_params=pltpu.CompilerParams(dimension_semantics=semantics),
        input_output_aliases=({0: 0} if donate_x else {}),
    )(x, pe)


if __name__ == "__main__":
    # Small shapes consistent with the module: batch=2, d_model=128 (lane-dense),
    # max_seq_len=16.  S=10 is deliberately not tile-aligned so the cdiv-padded
    # edge-block path is exercised.
    B, S, D, MAX_S = 2, 10, 128, 16

    key = jax.random.PRNGKey(0)
    x = jax.random.normal(key, (B, S, D), dtype=jnp.float32)

    pe = _build_pe(D, MAX_S, dtype=x.dtype)  # built once in x.dtype (no per-call cast)

    out = positional_encoding_forward(x, pe)
    out = jax.block_until_ready(out)

    # Reference check against plain-JAX semantics of the PyTorch forward.
    ref = x + pe[None, :S, :]
    assert out.shape == (B, S, D)
    assert out.dtype == x.dtype
    assert jnp.allclose(out, ref, atol=1e-6), "mismatch vs reference"

    print("KERNEL_OK")
</pallas_src>

<mosaic_0001>
module attributes {stable_mosaic.version = 11 : i64} {
  func.func @_add_pe_kernel(%arg0: i32, %arg1: memref<2x16x128xf32, #tpu.memory_space<vmem>>, %arg2: memref<16x128xf32, #tpu.memory_space<vmem>>, %arg3: memref<2x16x128xf32, #tpu.memory_space<vmem>>) attributes {dimension_semantics = [#tpu.dimension_semantics<parallel>], iteration_bounds = array<i64: 1>, scalar_prefetch = 0 : i64, scratch_operands = 0 : i64, tpu.core_type = #tpu.core_type<tc>, window_params = [{transform_indices = @transform_0, window_bounds = array<i64: 2, 16, 128>}, {transform_indices = @transform_1, window_bounds = array<i64: 16, 128>}, {transform_indices = @transform_2, window_bounds = array<i64: 2, 16, 128>}]} {
    %c0 = arith.constant 0 : index
    %c0_0 = arith.constant 0 : index
    %c0_1 = arith.constant 0 : index
    %0 = vector.load %arg1[%c0, %c0_0, %c0_1] : memref<2x16x128xf32, #tpu.memory_space<vmem>>, vector<2x16x128xf32>
    %c0_2 = arith.constant 0 : index
    %c0_3 = arith.constant 0 : index
    %1 = vector.load %arg2[%c0_2, %c0_3] : memref<16x128xf32, #tpu.memory_space<vmem>>, vector<16x128xf32>
    %2 = vector.shape_cast %1 : vector<16x128xf32> to vector<1x16x128xf32>
    %3 = vector.broadcast %2 : vector<1x16x128xf32> to vector<2x16x128xf32>
    %4 = arith.addf %0, %3 : vector<2x16x128xf32>
    %c0_4 = arith.constant 0 : index
    %c0_5 = arith.constant 0 : index
    %c0_6 = arith.constant 0 : index
    %5 = vector.load %arg3[%c0_4, %c0_5, %c0_6] : memref<2x16x128xf32, #tpu.memory_space<vmem>>, vector<2x16x128xf32>
    tpu.vector_store %arg3[%c0_4, %c0_5, %c0_6], %4 {strides = array<i32>} : memref<2x16x128xf32, #tpu.memory_space<vmem>>, vector<2x16x128xf32>,
    return
  }
  func.func @transform_0(%arg0: i32) -> (i32, i32, i32) {
    %c0_i32 = arith.constant 0 : i32
    %c0_i32_0 = arith.constant 0 : i32
    %c0_i32_1 = arith.constant 0 : i32
    return %c0_i32, %arg0, %c0_i32_0 : i32, i32, i32
  }
  func.func @transform_1(%arg0: i32) -> (i32, i32) {
    %c0_i32 = arith.constant 0 : i32
    %c0_i32_0 = arith.constant 0 : i32
    return %arg0, %c0_i32 : i32, i32
  }
  func.func @transform_2(%arg0: i32) -> (i32, i32, i32) {
    %c0_i32 = arith.constant 0 : i32
    %c0_i32_0 = arith.constant 0 : i32
    %c0_i32_1 = arith.constant 0 : i32
    return %c0_i32, %arg0, %c0_i32_0 : i32, i32, i32
  }
}

</mosaic_0001>

<bundles_post_ra>
// kernel: tpu_custom_call.1
= control target key start
LH: loop header
LB: loop body
LE: loop exit
PB: predicated region body
PF: predicated region fallthrough
CT: control target
= control target key end

     0   :  { %s74_s0 = inlined_call_operand.vmem [shape: f32[2,10,128], index: 0, kind: input, shape index: {}]   ;;  %s75_s1 = inlined_call_operand.vmem [shape: f32[16,128], index: 1, kind: input, shape index: {}]   ;;  %s76_s2 = inlined_call_operand.vmem [shape: f32[2,10,128], index: 2, kind: output, shape index: {}]  }
   0x1   :  { %v11_v0 = vld [vmem:[%s74_s0] sm:$0xff]  ;;  %v12_v2 = vld [vmem:[%s74_s0 + $0x8] sm:$0xff]  ;;  %v13_v5 = vld [vmem:[%s74_s0 + $0x10] sm:$0xff] }
   0x2   :  { %v15_v1 = vld [vmem:[%s75_s1] sm:$0xff]  ;;  %v16_v4 = vld [vmem:[%s75_s1 + $0x8] sm:$0xff]  ;;  %v14_v6 = vld [vmem:[%s74_s0 + $0x18] sm:$0xff] }
   0x3   :  { %v17_v3 = vadd.f32 %v15_v1, %v11_v0  ;;  %v18_v7 = vadd.f32 %v16_v4, %v12_v2  ;;  %v19_v8 = vadd.f32 %v15_v1, %v13_v5  ;;  %v20_v9 = vadd.f32 %v16_v4, %v14_v6 }
   0x5   :  { %21 = vst [vmem:[%s76_s2] sm:$0xff] %v17_v3 }
   0x6   :  { %22 = vst [vmem:[%s76_s2 + $0x8] sm:$0xff] %v18_v7 }
   0x7   :  { %23 = vst [vmem:[%s76_s2 + $0x10] sm:$0xff] %v19_v8 }
   0x8   :  { %24 = vst [vmem:[%s76_s2 + $0x18] sm:$0xff] %v20_v9 }

</bundles_post_ra>
